<compile_context>
chip_gen: v5e
topology: v5e:2x2
jax: 0.10.0
libtpu: 0.0.40
codegen_flags: <defaults>
</compile_context>

<pallas_src>
import functools

import numpy as np
import jax
import jax.numpy as jnp
from jax import lax
from jax.experimental import pallas as pl
from jax.experimental.pallas import tpu as pltpu

_EPS = 1e-6  # F.pairwise_distance default eps


def _contrastive_kernel(o1_ref, o2_ref, label_ref, sel_ref, out_ref, *,
                        margin, k, batch, tb, needs_mask):
    """Partial contrastive-loss sum for one batch tile.

    o1_ref, o2_ref : (TB, k*d)  k samples of width d packed per 128-lane row
    label_ref      : (TB, k)
    sel_ref        : (k*d, k)   0/1 group selector (resident, constant index_map)
    out_ref        : (1, 1, 1)  sum of per-sample losses of this tile
    """
    o1 = o1_ref[...].astype(jnp.float32)
    o2 = o2_ref[...].astype(jnp.float32)
    label = label_ref[...].astype(jnp.float32)

    diff = o1 - o2 + _EPS                        # (TB, k*d)
    sq = diff * diff                             # (TB, k*d)

    # Grouped per-sample reduction on the (otherwise idle) MXU. The selector is
    # 0/1, so HIGHEST-precision products are exact; accumulation is f32.
    sq_sum = lax.dot_general(
        sq, sel_ref[...], (((1,), (0,)), ((), ())),
        preferred_element_type=jnp.float32,
        precision=lax.Precision.HIGHEST)         # (TB, k)

    dist = jnp.sqrt(sq_sum)                      # euclidean distance per sample
    pos = (1.0 - label) * sq_sum                 # d^2 == sq_sum (skip d*d)
    neg = label * jnp.square(jnp.maximum(margin - dist, 0.0))
    per_sample = pos + neg                       # (TB, k)

    if needs_mask:
        # Mask samples past the true batch size (partial last tile and/or the
        # lane-packing pad). Must happen BEFORE the reduction/store: padded rows
        # may hold stale VMEM garbage (NaN/Inf); jnp.where drops it exactly.
        row = lax.broadcasted_iota(jnp.int32, per_sample.shape, 0)
        col = lax.broadcasted_iota(jnp.int32, per_sample.shape, 1)
        sample = (pl.program_id(0) * tb + row) * k + col
        per_sample = jnp.where(sample < batch, per_sample, 0.0)

    out_ref[...] = jnp.sum(per_sample, keepdims=True).reshape(1, 1, 1)


def _chip_budgets():
    """(working-set budget bytes, vmem_limit_bytes), gated on the local chip."""
    work_budget = 20 * 1024 * 1024            # v7x-safe default (64 MiB VMEM/TC)
    vmem_limit = 32 * 1024 * 1024
    try:
        vmem = getattr(pltpu.get_tpu_info(), "vmem_capacity_bytes", None)
        if vmem is not None and vmem >= 96 * 1024 * 1024:
            # v5e / v6e: 128 MiB physical VMEM -> open up the tile budget.
            work_budget = 48 * 1024 * 1024
            vmem_limit = 64 * 1024 * 1024
    except Exception:
        pass                                   # keep conservative defaults
    return work_budget, vmem_limit


def _pick_batch_tile(row_elems, itemsize, work_budget):
    # Per-row working set: 2 inputs x 2 pipeline buffers in the native dtype
    # plus ~3 live f32 temporaries (casts / diff / sq) of the same width.
    per_row = row_elems * (4 * itemsize + 3 * 4)
    return max(work_budget // per_row, 8)


def contrastive_loss(output1, output2, label, margin=2.0, *,
                     max_rows_per_tile=None):
    """output1, output2: (B, D); label: (B, 1). Returns scalar float32 loss."""
    B, D = output1.shape
    assert output2.shape == (B, D)
    assert label.shape == (B, 1)

    # --- lane packing for small feature dims --------------------------------
    k = 128 // D if (D < 128 and 128 % D == 0) else 1
    b_pad = -(-B // k) * k
    if b_pad != B:
        # Pad the batch to a multiple of k so the packed layout stays fully lane
        # dense; padded samples are masked inside the kernel.
        pad = ((0, b_pad - B), (0, 0))
        output1 = jnp.pad(output1, pad)
        output2 = jnp.pad(output2, pad)
        label = jnp.pad(label, pad)
    b_packed = b_pad // k
    kd = k * D
    o1 = output1.reshape(b_packed, kd)
    o2 = output2.reshape(b_packed, kd)
    lab = label.reshape(b_packed, k)
    # 0/1 group selector baked at trace time: lane j belongs to group j // D.
    sel = jnp.asarray(np.repeat(np.eye(k, dtype=np.float32), D, axis=0))

    # --- batch tile size (chip-gated VMEM budget) ----------------------------
    itemsize = int(jnp.dtype(output1.dtype).itemsize)
    sub = max(8, 32 // max(itemsize, 1))       # sublane alignment (16 for bf16)
    work_budget, vmem_limit = _chip_budgets()
    tb = _pick_batch_tile(kd, itemsize, work_budget)
    if max_rows_per_tile is not None:
        tb = min(tb, max(1, int(max_rows_per_tile)))
    if tb < b_packed:
        tb = max(sub, (tb // sub) * sub)       # sublane-aligned multi-tile
    if tb >= b_packed:
        if b_packed >= 2 * sub:
            # Split into >=2 grid steps: shards across v7x's two TensorCores and
            # lets the input stream double-buffer across tiles.
            half = (b_packed + 1) // 2
            tb = -(-half // sub) * sub
        else:
            tb = b_packed                      # single full-extent tile
    grid_n = -(-b_packed // tb)
    needs_mask = (grid_n * tb * k) != B        # tile padding and/or lane padding

    kernel = functools.partial(
        _contrastive_kernel, margin=float(margin), k=k,
        batch=B, tb=tb, needs_mask=needs_mask)

    # TODO(synk): pipeline_mode=pl.Buffered(3) on the two (tb, kd) streams is an
    # option if a profile shows DMA gaps at tile boundaries; default depth 2 kept.
    partial_sums = pl.pallas_call(
        kernel,
        out_shape=jax.ShapeDtypeStruct((grid_n, 1, 1), jnp.float32),
        grid_spec=pltpu.PrefetchScalarGridSpec(
            num_scalar_prefetch=0,
            grid=(grid_n,),
            in_specs=[
                pl.BlockSpec((tb, kd), lambda i: (i, 0)),   # output1 (packed)
                pl.BlockSpec((tb, kd), lambda i: (i, 0)),   # output2 (packed)
                pl.BlockSpec((tb, k), lambda i: (i, 0)),    # label   (packed)
                pl.BlockSpec((kd, k), lambda i: (0, 0)),    # selector (resident)
            ],
            out_specs=pl.BlockSpec((1, 1, 1), lambda i: (i, 0, 0)),
        ),
        compiler_params=pltpu.CompilerParams(
            dimension_semantics=("parallel",),
            vmem_limit_bytes=vmem_limit,
        ),
    )(o1, o2, lab, sel)

    # Only grid_n partial sums left; divide by the true batch size.
    return jnp.sum(partial_sums) / B


def _reference_loss(o1, o2, label, margin=2.0):
    # Pure-JAX reference mirroring the PyTorch module (compute in f32).
    o1 = o1.astype(jnp.float32)
    o2 = o2.astype(jnp.float32)
    label = label.astype(jnp.float32)
    d = jnp.sqrt(jnp.sum(jnp.square(o1 - o2 + _EPS), axis=-1, keepdims=True))
    return jnp.mean((1.0 - label) * d ** 2 +
                    label * jnp.square(jnp.clip(margin - d, 0.0)))


if __name__ == "__main__":
    key = jax.random.PRNGKey(0)

    def run_case(B, D, margin=2.0, dtype=jnp.float32, **kw):
        k1, k2, k3 = jax.random.split(jax.random.fold_in(key, B * 1000 + D), 3)
        o1 = jax.random.normal(k1, (B, D), dtype=jnp.float32).astype(dtype)
        o2 = jax.random.normal(k2, (B, D), dtype=jnp.float32).astype(dtype)
        # Binary labels (0 = similar, 1 = dissimilar), shape (B, 1).
        lab = jax.random.bernoulli(k3, p=0.5, shape=(B, 1)).astype(dtype)

        got = jax.block_until_ready(contrastive_loss(o1, o2, lab, margin, **kw))
        want = _reference_loss(o1, o2, lab, margin)
        assert jnp.allclose(got, want, rtol=2e-5, atol=1e-5), (B, D, got, want)

    run_case(8, 32)                            # lane-packed (k=4), single tile
    run_case(40, 32, max_rows_per_tile=8)      # multi-tile + partial-last-tile mask
    run_case(24, 128, max_rows_per_tile=8)     # k=1 path, exact tiling
    run_case(10, 32)                           # B % k != 0 -> wrapper pad + mask
    run_case(128, 32)                          # auto-split into >=2 grid steps
    run_case(32, 64, dtype=jnp.bfloat16)       # bf16 streamed without upcast

    print("KERNEL_OK")
</pallas_src>

<mosaic_0001>
module attributes {stable_mosaic.version = 11 : i64} {
  func.func @_contrastive_kernel(%arg0: i32, %arg1: memref<2x128xf32, #tpu.memory_space<vmem>>, %arg2: memref<2x128xf32, #tpu.memory_space<vmem>>, %arg3: memref<2x4xf32, #tpu.memory_space<vmem>>, %arg4: memref<128x4xf32, #tpu.memory_space<vmem>>, %arg5: memref<1x1x1xf32, #tpu.memory_space<vmem>>) attributes {dimension_semantics = [#tpu.dimension_semantics<parallel>], iteration_bounds = array<i64: 1>, scalar_prefetch = 0 : i64, scratch_operands = 0 : i64, tpu.core_type = #tpu.core_type<tc>, window_params = [{transform_indices = @transform_0, window_bounds = array<i64: 2, 128>}, {transform_indices = @transform_1, window_bounds = array<i64: 2, 128>}, {transform_indices = @transform_2, window_bounds = array<i64: 2, 4>}, {pipeline_mode = #tpu.pipeline_mode<synchronous>, transform_indices = @transform_3, window_bounds = array<i64: 128, 4>}, {transform_indices = @transform_4, window_bounds = array<i64: 1, 1, 1>}]} {
    %c0 = arith.constant 0 : index
    %c0_0 = arith.constant 0 : index
    %0 = vector.load %arg1[%c0, %c0_0] : memref<2x128xf32, #tpu.memory_space<vmem>>, vector<2x128xf32>
    %c0_1 = arith.constant 0 : index
    %c0_2 = arith.constant 0 : index
    %1 = vector.load %arg2[%c0_1, %c0_2] : memref<2x128xf32, #tpu.memory_space<vmem>>, vector<2x128xf32>
    %c0_3 = arith.constant 0 : index
    %c0_4 = arith.constant 0 : index
    %2 = vector.load %arg3[%c0_3, %c0_4] : memref<2x4xf32, #tpu.memory_space<vmem>>, vector<2x4xf32>
    %3 = arith.subf %0, %1 : vector<2x128xf32>
    %cst = arith.constant 9.99999997E-7 : f32
    %4 = vector.broadcast %cst : f32 to vector<2x128xf32>
    %5 = arith.addf %3, %4 : vector<2x128xf32>
    %6 = arith.mulf %5, %5 : vector<2x128xf32>
    %c0_5 = arith.constant 0 : index
    %c0_6 = arith.constant 0 : index
    %7 = vector.load %arg4[%c0_5, %c0_6] : memref<128x4xf32, #tpu.memory_space<vmem>>, vector<128x4xf32>
    %cst_7 = arith.constant dense<0.000000e+00> : vector<2x4xf32>
    %8 = tpu.matmul %6, %7, %cst_7 {dimension_numbers = #tpu.dot_dimension_numbers<[1], [0], [0], [1], [0, 0, 1, 1], [], []>, precision = #tpu.contract_precision<fp32>} : vector<2x128xf32>, vector<128x4xf32>, vector<2x4xf32> -> vector<2x4xf32>
    %9 = math.sqrt %8 : vector<2x4xf32>
    %cst_8 = arith.constant 1.000000e+00 : f32
    %10 = vector.broadcast %cst_8 : f32 to vector<2x4xf32>
    %11 = arith.subf %10, %2 : vector<2x4xf32>
    %12 = arith.mulf %11, %8 : vector<2x4xf32>
    %cst_9 = arith.constant 2.000000e+00 : f32
    %13 = vector.broadcast %cst_9 : f32 to vector<2x4xf32>
    %14 = arith.subf %13, %9 : vector<2x4xf32>
    %cst_10 = arith.constant 0.000000e+00 : f32
    %15 = vector.broadcast %cst_10 : f32 to vector<2x4xf32>
    %16 = arith.maximumf %14, %15 : vector<2x4xf32>
    %17 = arith.mulf %16, %16 : vector<2x4xf32>
    %18 = arith.mulf %2, %17 : vector<2x4xf32>
    %19 = arith.addf %12, %18 : vector<2x4xf32>
    %20 = vector.shape_cast %19 : vector<2x4xf32> to vector<1x2x4xf32>
    %cst_11 = arith.constant dense<0.000000e+00> : vector<1xf32>
    %21 = vector.multi_reduction <add>, %20, %cst_11 [1, 2] : vector<1x2x4xf32> to vector<1xf32>
    %22 = vector.shape_cast %21 : vector<1xf32> to vector<1x1x1xf32>
    %23 = vector.extract %22[0, 0, 0] : f32 from vector<1x1x1xf32>
    %24 = vector.broadcast %23 : f32 to vector<1x1xf32>
    %25 = vector.shape_cast %24 : vector<1x1xf32> to vector<1x1x1xf32>
    %c0_12 = arith.constant 0 : index
    %c0_13 = arith.constant 0 : index
    %c0_14 = arith.constant 0 : index
    %26 = vector.load %arg5[%c0_12, %c0_13, %c0_14] : memref<1x1x1xf32, #tpu.memory_space<vmem>>, vector<1x1x1xf32>
    tpu.vector_store %arg5[%c0_12, %c0_13, %c0_14], %25 {strides = array<i32>} : memref<1x1x1xf32, #tpu.memory_space<vmem>>, vector<1x1x1xf32>,
    return
  }
  func.func @transform_0(%arg0: i32) -> (i32, i32) {
    %c0_i32 = arith.constant 0 : i32
    %c0_i32_0 = arith.constant 0 : i32
    return %arg0, %c0_i32 : i32, i32
  }
  func.func @transform_1(%arg0: i32) -> (i32, i32) {
    %c0_i32 = arith.constant 0 : i32
    %c0_i32_0 = arith.constant 0 : i32
    return %arg0, %c0_i32 : i32, i32
  }
  func.func @transform_2(%arg0: i32) -> (i32, i32) {
    %c0_i32 = arith.constant 0 : i32
    %c0_i32_0 = arith.constant 0 : i32
    return %arg0, %c0_i32 : i32, i32
  }
  func.func @transform_3(%arg0: i32) -> (i32, i32) {
    %c0_i32 = arith.constant 0 : i32
    %c0_i32_0 = arith.constant 0 : i32
    %c0_i32_1 = arith.constant 0 : i32
    return %c0_i32, %c0_i32_0 : i32, i32
  }
  func.func @transform_4(%arg0: i32) -> (i32, i32, i32) {
    %c0_i32 = arith.constant 0 : i32
    %c0_i32_0 = arith.constant 0 : i32
    %c0_i32_1 = arith.constant 0 : i32
    return %arg0, %c0_i32, %c0_i32_0 : i32, i32, i32
  }
}

</mosaic_0001>

<bundles_post_ra>
// kernel: tpu_custom_call.1
= control target key start
LH: loop header
LB: loop body
LE: loop exit
PB: predicated region body
PF: predicated region fallthrough
CT: control target
= control target key end

     0   :  { %s785_s0 = inlined_call_operand.vmem [shape: f32[2,128], index: 0, kind: input, shape index: {}]   ;;  %s786_s1 = inlined_call_operand.vmem [shape: f32[2,128], index: 1, kind: input, shape index: {}]   ;;  %s787_s2 = inlined_call_operand.vmem [shape: f32[2,4], index: 2, kind: input, shape index: {}]   ;;  %s788_s3 = inlined_call_operand.vmem [shape: f32[128,4], index: 3, kind: input, shape index: {}]   ;;  %s789_s4 = inlined_call_operand.hbm [shape: f32[1,1,1], index: 4, kind: output, shape index: {}]  }
   0x1   :  { %v39_v0 = vld [vmem:[%s788_s3 + $0x78] sm:$0xff]  ;;  %v38_v1 = vld [vmem:[%s788_s3 + $0x70] sm:$0xff]  ;;  %v37_v2 = vld [vmem:[%s788_s3 + $0x68] sm:$0xff] }
   0x2   :  { %v496_v3 = vand.u32 4294901760, %v39_v0  ;;  %v498_v4 = vand.u32 4294901760, %v38_v1  ;;  %v500_v5 = vand.u32 4294901760, %v37_v2  ;;  %v36_v6 = vld [vmem:[%s788_s3 + $0x60] sm:$0xff]  ;;  %v35_v7 = vld [vmem:[%s788_s3 + $0x58] sm:$0xff]  ;;  %v34_v8 = vld [vmem:[%s788_s3 + $0x50] sm:$0xff] }
   0x3   :  { %v511_v9 = vand.u32 4294901760, %v36_v6  ;;  %v513_v10 = vand.u32 4294901760, %v35_v7  ;;  %v515_v11 = vand.u32 4294901760, %v34_v8  ;;  %v33_v12 = vld [vmem:[%s788_s3 + $0x48] sm:$0xff]  ;;  %v32_v13 = vld [vmem:[%s788_s3 + $0x40] sm:$0xff]  ;;  %v31_v18 = vld [vmem:[%s788_s3 + $0x38] sm:$0xff] }
   0x4   :  { %41 = vmatpush.msra.mxu0 %v496_v3  ;;  %v525_v14 = vsub.f32 %v39_v0, %v496_v3  ;;  %v528_v15 = vsub.f32 %v38_v1, %v498_v4  ;;  %v531_v16 = vsub.f32 %v37_v2, %v500_v5  ;;  %v533_v17 = vand.u32 4294901760, %v33_v12  ;;  %237 = vmatpush.msra.mxu3 %v496_v3  ;;  %v30_v26 = vld [vmem:[%s788_s3 + $0x30] sm:$0xff] }
   0x5   :  { %v540_v19 = vsub.f32 %v36_v6, %v511_v9  ;;  %v543_v20 = vsub.f32 %v35_v7, %v513_v10  ;;  %v546_v21 = vsub.f32 %v34_v8, %v515_v11  ;;  %v552_v25 = vand.u32 4294901760, %v32_v13 }
   0x6   :  { %43 = vmatpush.msra.mxu0 %v498_v4  ;;  %v83_v22 = vand.u32 4294901760, %v525_v14  ;;  %v89_v23 = vand.u32 4294901760, %v528_v15  ;;  %v95_v24 = vand.u32 4294901760, %v531_v16  ;;  %184 = vmatpush.msra.mxu2 %v525_v14  ;;  %v559_v28 = vand.u32 4294901760, %v31_v18 }
   0x7   :  { %v101_v27 = vand.u32 4294901760, %v540_v19  ;;  %v562_v29 = vsub.f32 %v33_v12, %v533_v17  ;;  %239 = vmatpush.msra.mxu3 %v498_v4 }
   0x8   :  { %9 = vsyncpa [#allocation3], 0  ;;  %45 = vmatpush.msra.mxu0 %v500_v5  ;;  %v84_v30 = vsub.f32 %v525_v14, %v83_v22  ;;  %v90_v31 = vsub.f32 %v528_v15, %v89_v23  ;;  %v96_v32 = vsub.f32 %v531_v16, %v95_v24  ;;  %v107_v33 = vand.u32 4294901760, %v543_v20  ;;  %187 = vmatpush.msra.mxu2 %v528_v15  ;;  %v29_v36 = vld [vmem:[%s788_s3 + $0x28] sm:$0xff]  ;;  %v28_v41 = vld [vmem:[%s788_s3 + $0x20] sm:$0xff]  ;;  %s421_s27 = sshll.u32 %s789_s4, 4  ;;  %s422_s27 = int_to_ptr.hbm [resolvable:$true] %s421_s27 }
   0x9   :  { %v113_v34 = vand.u32 4294901760, %v546_v21  ;;  %v578_v35 = vand.u32 4294901760, %v30_v26  ;;  %241 = vmatpush.msra.mxu3 %v500_v5  ;;  %v102_v39 = vsub.f32 %v540_v19, %v101_v27  ;;  %v589_v40 = vsub.f32 %v32_v13, %v552_v25  ;;  %v27_v47 = vld [vmem:[%s788_s3 + $0x18] sm:$0xff]  ;;  %v26_v55 = vld [vmem:[%s788_s3 + $0x10] sm:$0xff]  ;;  %v25_v60 = vld [vmem:[%s788_s3 + $0x8] sm:$0xff] }
   0xa   :  { %v85_v37 = vand.u32 4294901760, %v84_v30  ;;  %47 = vmatpush.msra.mxu0 %v511_v9  ;;  %v91_v38 = vand.u32 4294901760, %v90_v31  ;;  %190 = vmatpush.msra.mxu2 %v531_v16  ;;  %v119_v42 = vand.u32 4294901760, %v562_v29  ;;  %v97_v43 = vand.u32 4294901760, %v96_v32  ;;  %v18_v61 = vld [vmem:[%s785_s0] sm:$0x3] }
   0xb   :  { %243 = vmatpush.msra.mxu3 %v511_v9  ;;  %v108_v44 = vsub.f32 %v543_v20, %v107_v33  ;;  %v601_v45 = vand.u32 4294901760, %v29_v36  ;;  %v604_v46 = vsub.f32 %v31_v18, %v559_v28  ;;  %v609_v48 = vand.u32 4294901760, %v28_v41  ;;  %v19_v62 = vld [vmem:[%s786_s1] sm:$0x3] }
   0xc   :  { %86 = vmatpush.msra.mxu1 %v85_v37  ;;  %49 = vmatpush.msra.mxu0 %v513_v10  ;;  %v103_v49 = vand.u32 4294901760, %v102_v39  ;;  %v114_v50 = vsub.f32 %v546_v21, %v113_v34  ;;  %v125_v51 = vand.u32 4294901760, %v589_v40  ;;  %v619_v52 = vsub.f32 %v30_v26, %v578_v35  ;;  %v24_v6 = vld [vmem:[%s788_s3] sm:$0xff] }
   0xd   :  { %193 = vmatpush.msra.mxu2 %v540_v19  ;;  %245 = vmatpush.msra.mxu3 %v513_v10  ;;  %v120_v53 = vsub.f32 %v562_v29, %v119_v42  ;;  %v624_v54 = vand.u32 4294901760, %v27_v47  ;;  %v109_v56 = vand.u32 4294901760, %v108_v44  ;;  %v131_v57 = vand.u32 4294901760, %v604_v46 }
   0xe   :  { %92 = vmatpush.msra.mxu1 %v91_v38  ;;  %51 = vmatpush.msra.mxu0 %v515_v11  ;;  %v634_v58 = vsub.f32 %v29_v36, %v601_v45  ;;  %v637_v59 = vsub.f32 %v28_v41, %v609_v48  ;;  %v115_v63 = vand.u32 4294901760, %v114_v50  ;;  %v126_v0 = vsub.f32 %v589_v40, %v125_v51 }
   0xf   :  { %196 = vmatpush.msra.mxu2 %v543_v20  ;;  %247 = vmatpush.msra.mxu3 %v515_v11  ;;  %v137_v1 = vand.u32 4294901760, %v619_v52  ;;  %v655_v2 = vand.u32 4294901760, %v26_v55  ;;  %v121_v7 = vand.u32 4294901760, %v120_v53  ;;  %v661_v8 = vsub.f32 %v27_v47, %v624_v54 }
  0x10   :  { %98 = vmatpush.msra.mxu1 %v97_v43  ;;  %53 = vmatpush.msra.mxu0 %v533_v17  ;;  %v132_v12 = vsub.f32 %v604_v46, %v131_v57  ;;  %v143_v13 = vand.u32 4294901760, %v634_v58  ;;  %v670_v18 = vand.u32 4294901760, %v25_v60  ;;  %v21_v26 = vsub.f32 %v18_v61, %v19_v62 }
  0x11   :  { %199 = vmatpush.msra.mxu2 %v546_v21  ;;  %249 = vmatpush.msra.mxu3 %v533_v17  ;;  %v149_v30 = vand.u32 4294901760, %v637_v59  ;;  %v673_v31 = vand.u32 4294901760, %v24_v6  ;;  %v127_v32 = vand.u32 4294901760, %v126_v0  ;;  %v138_v36 = vsub.f32 %v619_v52, %v137_v1 }
  0x12   :  { %104 = vmatpush.msra.mxu1 %v103_v49  ;;  %55 = vmatpush.msra.mxu0 %v552_v25  ;;  %v682_v37 = vsub.f32 %v26_v55, %v655_v2  ;;  %v22_v38 = vadd.f32 1e-06, %v21_v26  ;;  %v155_v39 = vand.u32 4294901760, %v661_v8  ;;  %v133_v41 = vand.u32 4294901760, %v132_v12 }
  0x13   :  { %202 = vmatpush.msra.mxu2 %v562_v29  ;;  %251 = vmatpush.msra.mxu3 %v552_v25  ;;  %v144_v43 = vsub.f32 %v634_v58, %v143_v13  ;;  %v692_v44 = vsub.f32 %v25_v60, %v670_v18  ;;  %v150_v49 = vsub.f32 %v637_v59, %v149_v30  ;;  %v139_v50 = vand.u32 4294901760, %v138_v36 }
  0x14   :  { %110 = vmatpush.msra.mxu1 %v109_v56  ;;  %57 = vmatpush.msra.mxu0 %v559_v28  ;;  %v23_v47 = vmul.f32 %v22_v38, %v22_v38  ;;  %v161_v53 = vand.u32 4294901760, %v682_v37  ;;  %v702_v55 = vsub.f32 %v24_v6, %v673_v31  ;;  %v156_v61 = vsub.f32 %v661_v8, %v155_v39 }
  0x15   :  { %205 = vmatpush.msra.mxu2 %v589_v40  ;;  %253 = vmatpush.msra.mxu3 %v559_v28  ;;  %v145_v60 = vand.u32 4294901760, %v144_v43  ;;  %v167_v62 = vand.u32 4294901760, %v692_v44  ;;  %v151_v0 = vand.u32 4294901760, %v150_v49  ;;  %vm400_vm2 = vcmask 25600  }
  0x16   :  { %116 = vmatpush.msra.mxu1 %v115_v63  ;;  %59 = vmatpush.msra.mxu0 %v578_v35  ;;  %v704_v56 = vand.u32 4294901760, %v23_v47  ;;  %v162_v6 = vsub.f32 %v682_v37, %v161_v53  ;;  %v157_v26 = vand.u32 4294901760, %v156_v61  ;;  %vm412_vm3 = vcmask 0  }
  0x17   :  { %208 = vmatpush.msra.mxu2 %v604_v46  ;;  %255 = vmatpush.msra.mxu3 %v578_v35 }
  0x18   :  { %122 = vmatpush.msra.mxu1 %v121_v7  ;;  %61 = vmatpush.msra.mxu0 %v601_v45  ;;  %v73_v63 = vsub.f32 %v23_v47, %v704_v56  ;;  %v173_v7 = vand.u32 4294901760, %v702_v55  ;;  %v163_v38 = vand.u32 4294901760, %v162_v6 }
  0x19   :  { %211 = vmatpush.msra.mxu2 %v619_v52  ;;  %257 = vmatpush.msra.mxu3 %v601_v45 }
  0x1a   :  { %128 = vmatpush.msra.mxu1 %v127_v32  ;;  %63 = vmatpush.msra.mxu0 %v609_v48  ;;  %v74_v12 = vand.u32 4294901760, %v73_v63  ;;  %v168_v32 = vsub.f32 %v692_v44, %v167_v62 }
  0x1b   :  { %214 = vmatpush.msra.mxu2 %v634_v58  ;;  %259 = vmatpush.msra.mxu3 %v609_v48 }
  0x1c   :  { %134 = vmatpush.msra.mxu1 %v133_v41  ;;  %65 = vmatpush.msra.mxu0 %v624_v54  ;;  %v75_v36 = vsub.f32 %v73_v63, %v74_v12  ;;  %v174_v41 = vsub.f32 %v702_v55, %v173_v7  ;;  %v169_v43 = vand.u32 4294901760, %v168_v32 }
  0x1d   :  { %217 = vmatpush.msra.mxu2 %v637_v59  ;;  %261 = vmatpush.msra.mxu3 %v624_v54 }
  0x1e   :  { %140 = vmatpush.msra.mxu1 %v139_v50  ;;  %67 = vmatpush.msra.mxu0 %v655_v2  ;;  %v76_v47 = vand.u32 4294901760, %v75_v36  ;;  %v175_v49 = vand.u32 4294901760, %v174_v41 }
  0x1f   :  { %220 = vmatpush.msra.mxu2 %v661_v8  ;;  %263 = vmatpush.msra.mxu3 %v655_v2 }
  0x20   :  { %146 = vmatpush.msra.mxu1 %v145_v60  ;;  %69 = vmatpush.msra.mxu0 %v670_v18 }
  0x21   :  { %223 = vmatpush.msra.mxu2 %v682_v37  ;;  %265 = vmatpush.msra.mxu3 %v670_v18 }
  0x22   :  { %152 = vmatpush.msra.mxu1 %v151_v0  ;;  %71 = vmatpush.msra.mxu0 %v673_v31 }
  0x23   :  { %226 = vmatpush.msra.mxu2 %v692_v44  ;;  %267 = vmatpush.msra.mxu3 %v673_v31 }
  0x24   :  { %278 = vmatpush.msrb.mxu0 %v83_v22  ;;  %158 = vmatpush.msra.mxu1 %v157_v26 }
  0x25   :  { %229 = vmatpush.msra.mxu2 %v702_v55  ;;  %271 = vmatmul.f32.vlgmr.msra.gmra.mxu3 %v74_v12 }
  0x26   :  { %282 = vmatpush.msrb.mxu0 %v89_v23  ;;  %164 = vmatpush.msra.mxu1 %v163_v38 }
  0x27   :  { %232 = vmatmul.f32.vlgmr.msra.gmra.mxu2 %v73_v63  ;;  %77 = vmatmul.f32.vlgmr.msra.gmra.mxu0 %v76_v47 }
  0x28   :  { %286 = vmatpush.msrb.mxu0 %v95_v24  ;;  %170 = vmatpush.msra.mxu1 %v169_v43 }
  0x2a   :  { %290 = vmatpush.msrb.mxu0 %v101_v27  ;;  %176 = vmatpush.msra.mxu1 %v175_v49 }
  0x2b   :  { %178 = vmatmul.f32.vlgmr.msra.gmra.mxu1 %v704_v56 }
  0x2c   :  { %345 = vmatpush.msrb.mxu1 %v496_v3  ;;  %294 = vmatpush.msrb.mxu0 %v107_v33  ;;  %v20_v33 = vld [vmem:[%s787_s2] sm:$0x3]  ;;  %s461_s2 = smov [#allocation2]  }
  0x2d   :  { %v393_v40 = vsub.f32 1.0, %v20_v33  ;;  %s419_s3 = sshll.u32 %s461_s2, 4  ;;  %s420_s3 = int_to_ptr.vmem [resolvable:$true] %s419_s3 }
  0x2e   :  { %347 = vmatpush.msrb.mxu1 %v498_v4  ;;  %298 = vmatpush.msrb.mxu0 %v113_v34 }
  0x30   :  { %349 = vmatpush.msrb.mxu1 %v500_v5  ;;  %302 = vmatpush.msrb.mxu0 %v119_v42 }
  0x32   :  { %351 = vmatpush.msrb.mxu1 %v511_v9  ;;  %306 = vmatpush.msrb.mxu0 %v125_v51 }
  0x34   :  { %353 = vmatpush.msrb.mxu1 %v513_v10  ;;  %310 = vmatpush.msrb.mxu0 %v131_v57 }
  0x36   :  { %355 = vmatpush.msrb.mxu1 %v515_v11  ;;  %314 = vmatpush.msrb.mxu0 %v137_v1 }
  0x38   :  { %357 = vmatpush.msrb.mxu1 %v533_v17  ;;  %318 = vmatpush.msrb.mxu0 %v143_v13 }
  0x3a   :  { %359 = vmatpush.msrb.mxu1 %v552_v25  ;;  %322 = vmatpush.msrb.mxu0 %v149_v30 }
  0x3c   :  { %361 = vmatpush.msrb.mxu1 %v559_v28  ;;  %326 = vmatpush.msrb.mxu0 %v155_v39 }
  0x3e   :  { %363 = vmatpush.msrb.mxu1 %v578_v35  ;;  %330 = vmatpush.msrb.mxu0 %v161_v53 }
  0x40   :  { %365 = vmatpush.msrb.mxu1 %v601_v45  ;;  %334 = vmatpush.msrb.mxu0 %v167_v62 }
  0x42   :  { %367 = vmatpush.msrb.mxu1 %v609_v48  ;;  %338 = vmatpush.msrb.mxu0 %v173_v7 }
  0x43   :  { %340 = vmatmul.f32.vlgmr.msrb.gmra.mxu0 %v704_v56 }
  0x44   :  { %369 = vmatpush.msrb.mxu1 %v624_v54 }
  0x46   :  { %371 = vmatpush.msrb.mxu1 %v655_v2 }
  0x48   :  { %373 = vmatpush.msrb.mxu1 %v670_v18 }
  0x4a   :  { %375 = vmatpush.msrb.mxu1 %v673_v31 }
  0x4b   :  { %377 = vmatmul.f32.vlgmr.msrb.gmra.mxu1 %v704_v56 }
  0xa4   :  { %v78_v4 = vpop.f32.mrf.mxu0 }
  0xa8   :  { %v179_v3 = vpop.f32.mrf.mxu1  ;;  %v272_v11 = vpop.f32.mrf.mxu3 }
  0xa9   :  { %v180_v5 = vadd.f32 %v179_v3, %v78_v4 }
  0xaa   :  { %v233_v9 = vpop.f32.mrf.mxu2 }
  0xab   :  { %v234_v10 = vadd.f32 %v233_v9, %v180_v5 }
  0xad   :  { %v273_v14 = vadd.f32 %v272_v11, %v234_v10 }
  0xc0   :  { %v341_v15 = vpop.f32.mrf.mxu0 }
  0xc1   :  { %v342_v16 = vadd.f32 %v341_v15, %v273_v14 }
  0xc8   :  { %v378_v17 = vpop.f32.mrf.mxu1 }
  0xc9   :  { %v379_v19 = vadd.f32 %v378_v17, %v342_v16 }
  0xcb   :  { %433 = vrsqrt.f32 %v379_v19  ;;  %vm388_vm0 = vcmp.eq.f32.partialorder %v379_v19, inf  ;;  %v391_v28 = vand.u32 2147483648, %v379_v19  ;;  %vm390_vm1 = vcmp.eq.f32.partialorder %v379_v19, 0.0 }
  0xcc   :  { %v394_v46 = vmul.f32 %v393_v40, %v379_v19 }
  0xd1   :  { %v434_v20 = vpop.eup %433 }
  0xd2   :  { %v382_v21 = vmul.f32 %v434_v20, %v379_v19 }
  0xd4   :  { %v383_v22 = vmul.f32 %v434_v20, %v382_v21 }
  0xd6   :  { %v384_v23 = vmul.f32 0.5, %v383_v22 }
  0xd8   :  { %v385_v24 = vsub.f32 1.5, %v384_v23 }
  0xda   :  { %v386_v25 = vmul.f32 %v434_v20, %v385_v24 }
  0xdc   :  { %v387_v27 = vmul.f32 %v386_v25, %v379_v19 }
  0xde   :  { %v389_v29 = vsel %vm388_vm0, %v379_v19, %v387_v27 }
  0xdf   :  { %v392_v34 = vsel %vm390_vm1, %v391_v28, %v389_v29 }
  0xe0   :  { %v395_v35 = vsub.f32 2.0, %v392_v34 }
  0xe2   :  { %v396_v42 = vmax.f32 %v395_v35, 0.0 }
  0xe4   :  { %v397_v45 = vmul.f32 %v396_v42, %v396_v42 }
  0xe6   :  { %v398_v48 = vmul.f32 %v397_v45, %v20_v33 }
  0xe8   :  { %v399_v51 = vadd.f32 %v398_v48, %v394_v46 }
  0xea   :  { %v401_v52 = vsel %vm400_vm2, %v399_v51, 0.0 }
  0xeb   :  { %402 = vadd.xlane.f32.xlu0 %v401_v52 }
 0x15e   :  { %v403_v54 = vpop.xlane.xlu0 %402 }
 0x15f   :  { %v404_v57 = vrot.slane %v403_v54, 4 }
 0x161   :  { %v405_v58 = vadd.f32 %v404_v57, %v403_v54 }
 0x163   :  { %v406_v59 = vrot.slane %v405_v58, 2 }
 0x165   :  { %v407_v1 = vadd.f32 %v406_v59, %v405_v58 }
 0x167   :  { %v408_v2 = vrot.slane %v407_v1, 1 }
 0x169   :  { %v409_v8 = vadd.f32 %v408_v2, %v407_v1 }
 0x16b   :  { %430 = vpush %v409_v8 }
 0x19c   :  { %s431_s28 = spop %430 }
 0x19d   :  { %v411_v13 = vstv %s431_s28 }
 0x19e   :  { %413 = vst.msk [vmem:[#allocation2] sm:$0x1] %vm412_vm3, %v411_v13 }
 0x19f   :  { %424 = dma.vmem_to_hbm [thread:$0]  %s420_s3, 16, %s422_s27, [#allocation3]  }
 0x1a0   :  { %459 = dma.done.wait [#allocation3], 16  }
 0x1a1   :  { %460 = vsyncadd [#allocation3], 4294967280 }
 0x1a2   :  { %429 = vsyncpa [#allocation3], 1 }

</bundles_post_ra>
